<compile_context>
chip_gen: v7x
topology: tpu7x:2x2x1
jax: 0.10.0
libtpu: 0.0.40
codegen_flags: <defaults>
</compile_context>

<pallas_src>
import jax
import jax.numpy as jnp
from jax.experimental import pallas as pl
from jax.experimental.pallas import tpu as pltpu

_MXU_ALIGN = 128


def _round_up(x, m):
    return (x + m - 1) // m * m


def _sublane_align(dtype):
    # 8 sublanes of 32-bit; sub-32-bit dtypes pack along sublanes.
    return max(8, 32 // jnp.dtype(dtype).itemsize)


def _balanced_tile(dim, target, align):
    """Pick a tile <= target (align-multiple) that minimizes padding overshoot."""
    dp = _round_up(max(dim, 1), align)
    t = _round_up(min(target, dp), align)
    steps = -(-dp // t)
    t = _round_up(-(-dp // steps), align)
    return t, t * steps  # (tile, padded_dim)


def _tpu_generation():
    try:
        kind = jax.devices()[0].device_kind.lower()
    except Exception:
        return None
    for tag in ("v7", "v6", "v5"):
        if tag in kind:
            return tag
    return None


# ---------------------------------------------------------------------------
# Glue: torch.masked_scatter semantics
#   out[i] = source[popcount(mask[:i])] where mask[i] is True (row-major),
#   out[i] = base[i]                    where mask[i] is False.
# ---------------------------------------------------------------------------
def masked_scatter(base, mask, source):
    if source.shape[0] == 0:  # all-False mask: nothing to scatter
        return base
    flat_base = base.reshape(-1)
    flat_mask = mask.reshape(-1)
    gather_idx = jnp.clip(jnp.cumsum(flat_mask.astype(jnp.int32)) - 1, 0, source.shape[0] - 1)
    return jnp.where(flat_mask, source[gather_idx], flat_base).reshape(base.shape)


# ---------------------------------------------------------------------------
# Pallas kernels
# ---------------------------------------------------------------------------
def _linear_kernel_single_k(x_ref, w_ref, b_ref, o_ref):
    # Whole (padded) K fits one tile: 2-D grid, no accumulator, no phase branches.
    acc = jnp.dot(x_ref[...], w_ref[...], preferred_element_type=jnp.float32)
    o_ref[...] = (acc + b_ref[...].astype(jnp.float32)).astype(o_ref.dtype)


def _linear_kernel_multi_k_f32(x_ref, w_ref, b_ref, o_ref):
    # f32 output: accumulate directly into the resident output block (no scratch).
    k = pl.program_id(2)

    @pl.when(k == 0)
    def _():
        o_ref[...] = jnp.broadcast_to(b_ref[...], o_ref.shape).astype(o_ref.dtype)

    o_ref[...] += jnp.dot(x_ref[...], w_ref[...], preferred_element_type=jnp.float32)


def _linear_kernel_multi_k_acc(x_ref, w_ref, b_ref, o_ref, acc_ref):
    # Narrow (e.g. bf16) output: keep an f32 VMEM accumulator, finalize on last k.
    k = pl.program_id(2)

    @pl.when(k == 0)
    def _():
        acc_ref[...] = jnp.zeros_like(acc_ref)

    acc_ref[...] += jnp.dot(x_ref[...], w_ref[...], preferred_element_type=jnp.float32)

    @pl.when(k == pl.num_programs(2) - 1)
    def _():
        o_ref[...] = (acc_ref[...] + b_ref[...].astype(jnp.float32)).astype(o_ref.dtype)


def _pallas_linear(x, w_t, b, *, tm, tn, tk, out_dtype, multi_core, vmem_limit):
    M, K = x.shape
    N = w_t.shape[1]
    m_align = _sublane_align(x.dtype)

    # Balanced tiles: padding overshoot per axis stays below one alignment unit per step.
    tm, Mp = _balanced_tile(M, tm, m_align)
    tn, Np = _balanced_tile(N, tn, _MXU_ALIGN)
    tk, Kp = _balanced_tile(K, tk, _MXU_ALIGN)

    # v7x has 2 TensorCores sharded over the "parallel" axes: make sure there are >= 2
    # output tiles whenever the problem allows it.
    if multi_core and (Mp // tm) * (Np // tn) < 2:
        if Np >= 2 * _MXU_ALIGN:
            tn, Np = _balanced_tile(N, max(_MXU_ALIGN, _round_up(Np // 2, _MXU_ALIGN)), _MXU_ALIGN)
        elif Mp >= 2 * m_align:
            tm, Mp = _balanced_tile(M, max(m_align, _round_up(Mp // 2, m_align)), m_align)

    x_p = x if (Mp == M and Kp == K) else jnp.pad(x, ((0, Mp - M), (0, Kp - K)))
    w_p = w_t if (Kp == K and Np == N) else jnp.pad(w_t, ((0, Kp - K), (0, Np - N)))
    b_p = (b if Np == N else jnp.pad(b, (0, Np - N))).reshape(1, Np)

    gm, gn, gk = Mp // tm, Np // tn, Kp // tk

    op_bytes = jnp.dtype(x.dtype).itemsize
    out_bytes = jnp.dtype(out_dtype).itemsize
    cost = pl.CostEstimate(
        flops=2 * Mp * Np * Kp,
        # padded shapes, including the tile re-read factors (x read gn times, W read gm times)
        bytes_accessed=op_bytes * (Mp * Kp * gn + Kp * Np * gm)
        + 4 * Np
        + out_bytes * Mp * Np,
        transcendentals=0,
    )

    if gk == 1:
        grid = (gm, gn)
        kernel = _linear_kernel_single_k
        in_specs = [
            pl.BlockSpec((tm, tk), lambda i, j: (i, 0)),
            pl.BlockSpec((tk, tn), lambda i, j: (0, j)),
            pl.BlockSpec((1, tn), lambda i, j: (0, j)),
        ]
        out_specs = pl.BlockSpec((tm, tn), lambda i, j: (i, j))
        scratch_shapes = []
        dim_sem = ("parallel", "parallel")
    else:
        grid = (gm, gn, gk)
        in_specs = [
            pl.BlockSpec((tm, tk), lambda i, j, k: (i, k)),
            pl.BlockSpec((tk, tn), lambda i, j, k: (k, j)),
            pl.BlockSpec((1, tn), lambda i, j, k: (0, j)),
        ]
        out_specs = pl.BlockSpec((tm, tn), lambda i, j, k: (i, j))
        dim_sem = ("parallel", "parallel", "arbitrary")
        if jnp.dtype(out_dtype) == jnp.dtype(jnp.float32):
            kernel = _linear_kernel_multi_k_f32
            scratch_shapes = []
        else:
            kernel = _linear_kernel_multi_k_acc
            scratch_shapes = [pltpu.VMEM((tm, tn), jnp.float32)]

    out = pl.pallas_call(
        kernel,
        out_shape=jax.ShapeDtypeStruct((Mp, Np), out_dtype),
        grid_spec=pltpu.PrefetchScalarGridSpec(
            num_scalar_prefetch=0,
            grid=grid,
            in_specs=in_specs,
            out_specs=out_specs,
            scratch_shapes=scratch_shapes,
        ),
        compiler_params=pltpu.CompilerParams(
            dimension_semantics=dim_sem,
            vmem_limit_bytes=vmem_limit,
        ),
        cost_estimate=cost,
    )(x_p, w_p, b_p)

    if Mp != M or Np != N:
        out = out[:M, :N]
    return out


def masked_linear(x, weight, bias, weight_mask, bias_mask, weight_params, bias_params,
                  *, tm=None, tn=None, tk=None, operand_dtype=jnp.bfloat16,
                  min_pallas_elems=128 * 128 * 128):
    """Forward pass of MaskedLinear.

    weight/bias are the fixed 'input' buffers of MaskedParameter; weight_params/bias_params are
    the optimized (masked_select'ed) parameters.  Operands are fed to the MXU in bf16 by default
    (f32 accumulation); pass operand_dtype=jnp.float32 for a full-precision matmul.
    """
    eff_w = masked_scatter(weight, weight_mask, weight_params)   # (N, K)
    eff_b = masked_scatter(bias, bias_mask, bias_params)         # (N,)

    M, K = x.shape
    N = eff_w.shape[0]

    # Tiny layers: a pallas_call is pure launch/DMA overhead — let XLA fuse it.
    if M * K * N < min_pallas_elems:
        return (x @ eff_w.T + eff_b).astype(x.dtype)

    # Generation-gated defaults (tiles + VMEM limit).
    gen = _tpu_generation()
    if gen == "v7":
        # 64 MiB VMEM per TC: cap the scoped limit, and feed both TensorCores.
        d_tm, d_tn, d_tk, vmem, multi_core = 512, 512, 1024, 48 * 1024 * 1024, True
    elif gen in ("v6", "v5"):
        # 128 MiB VMEM, lower HBM BW: large output tiles raise arithmetic intensity.
        d_tm, d_tn, d_tk, vmem, multi_core = 512, 512, 1024, 64 * 1024 * 1024, False
    else:
        d_tm, d_tn, d_tk, vmem, multi_core = 256, 256, 1024, 32 * 1024 * 1024, False
    tm = tm or d_tm
    tn = tn or d_tn
    tk = tk or d_tk

    out_dtype = x.dtype
    op_dtype = operand_dtype if operand_dtype is not None else x.dtype

    # Order: scatter -> transpose -> cast (single fused pass over W in XLA); pads happen inside
    # _pallas_linear and are skipped when the shape is already aligned.
    # TODO(synk): when masks/params are static across calls, cache the padded/transposed bf16
    # weight outside this function to avoid re-doing the scatter glue every step.
    x_in = x.astype(op_dtype)
    w_t = eff_w.T.astype(op_dtype)                               # (K, N): lane-dense output in N

    return _pallas_linear(x_in, w_t, eff_b.astype(jnp.float32),
                          tm=tm, tn=tn, tk=tk, out_dtype=out_dtype,
                          multi_core=multi_core, vmem_limit=vmem)


if __name__ == "__main__":
    key = jax.random.PRNGKey(0)
    keys = jax.random.split(key, 10)
    k_x, k_w, k_b, k_wm, k_bm, k_x2, k_w2, k_b2, k_wm2, k_bm2 = keys

    # ---------------- Test 1: single-K-step Pallas path, N not a 128-multiple ----------------
    B, K, N = 64, 320, 192
    x = jax.random.normal(k_x, (B, K), dtype=jnp.float32)
    weight = jax.random.normal(k_w, (N, K), dtype=jnp.float32) * 0.1
    bias = jax.random.normal(k_b, (N,), dtype=jnp.float32) * 0.1
    weight_mask = jax.random.bernoulli(k_wm, 0.5, (N, K))
    bias_mask = jax.random.bernoulli(k_bm, 0.5, (N,))
    # MaskedParameter starts optimized params as masked_select(input, mask); perturb so the
    # masked_scatter actually matters.
    weight_params = weight[weight_mask] + 0.5
    bias_params = bias[bias_mask] + 0.5

    y = masked_linear(x, weight, bias, weight_mask, bias_mask, weight_params, bias_params)
    jax.block_until_ready(y)

    eff_w = masked_scatter(weight, weight_mask, weight_params)
    eff_b = masked_scatter(bias, bias_mask, bias_params)
    xb = x.astype(jnp.bfloat16).astype(jnp.float32)
    wb = eff_w.astype(jnp.bfloat16).astype(jnp.float32)
    y_ref = jnp.dot(xb, wb.T, precision=jax.lax.Precision.HIGHEST) + eff_b
    assert y.shape == y_ref.shape and y.dtype == x.dtype
    assert jnp.allclose(y, y_ref, atol=1e-2, rtol=1e-3), "mismatch (single-K path)"

    # ------------- Test 2: multi-K-step path, f32 output (direct-accumulate kernel) -----------
    B2, K2, N2 = 64, 2304, 384
    x2 = jax.random.normal(k_x2, (B2, K2), dtype=jnp.float32)
    weight2 = jax.random.normal(k_w2, (N2, K2), dtype=jnp.float32) * 0.1
    bias2 = jax.random.normal(k_b2, (N2,), dtype=jnp.float32) * 0.1
    wm2 = jax.random.bernoulli(k_wm2, 0.5, (N2, K2))
    bm2 = jax.random.bernoulli(k_bm2, 0.5, (N2,))
    wp2 = weight2[wm2] + 0.5
    bp2 = bias2[bm2] + 0.5

    y2 = masked_linear(x2, weight2, bias2, wm2, bm2, wp2, bp2)
    jax.block_until_ready(y2)

    eff_w2 = masked_scatter(weight2, wm2, wp2)
    eff_b2 = masked_scatter(bias2, bm2, bp2)
    x2b = x2.astype(jnp.bfloat16).astype(jnp.float32)
    w2b = eff_w2.astype(jnp.bfloat16).astype(jnp.float32)
    y2_ref = jnp.dot(x2b, w2b.T, precision=jax.lax.Precision.HIGHEST) + eff_b2
    assert jnp.allclose(y2, y2_ref, atol=1e-2, rtol=1e-3), "mismatch (multi-K f32 path)"

    # --------- Test 3: multi-K-step path with bf16 output (f32-scratch accumulate kernel) -----
    y3 = masked_linear(x2.astype(jnp.bfloat16), weight2, bias2, wm2, bm2, wp2, bp2)
    jax.block_until_ready(y3)
    assert y3.dtype == jnp.bfloat16
    assert jnp.allclose(y3.astype(jnp.float32), y2_ref, atol=0.5, rtol=2e-2), \
        "mismatch (multi-K bf16 path)"

    # --------------- Test 4: tiny-layer shape-gated fallback (bypasses Pallas) ----------------
    xs = x[:8, :32]
    ws, bs = weight[:16, :32], bias[:16]
    wms, bms = weight_mask[:16, :32], bias_mask[:16]
    wps, bps = ws[wms] + 0.5, bs[bms] + 0.5
    ys = masked_linear(xs, ws, bs, wms, bms, wps, bps)
    ys_ref = xs @ masked_scatter(ws, wms, wps).T + masked_scatter(bs, bms, bps)
    assert jnp.allclose(ys, ys_ref, atol=1e-5), "mismatch (fallback path)"

    print("KERNEL_OK")
</pallas_src>

<mosaic_0001>
module attributes {stable_mosaic.version = 11 : i64} {
  func.func @_linear_kernel_single_k(%arg0: i32, %arg1: i32, %arg2: memref<64x384xbf16, #tpu.memory_space<vmem>>, %arg3: memref<384x256xbf16, #tpu.memory_space<vmem>>, %arg4: memref<1x256xf32, #tpu.memory_space<vmem>>, %arg5: memref<64x256xf32, #tpu.memory_space<vmem>>) attributes {dimension_semantics = [#tpu.dimension_semantics<parallel>, #tpu.dimension_semantics<parallel>], iteration_bounds = array<i64: 1, 1>, scalar_prefetch = 0 : i64, scratch_operands = 0 : i64, tpu.core_type = #tpu.core_type<tc>, window_params = [{transform_indices = @transform_0, window_bounds = array<i64: 64, 384>}, {transform_indices = @transform_1, window_bounds = array<i64: 384, 256>}, {transform_indices = @transform_2, window_bounds = array<i64: 1, 256>}, {transform_indices = @transform_3, window_bounds = array<i64: 64, 256>}]} {
    %c0 = arith.constant 0 : index
    %c0_0 = arith.constant 0 : index
    %0 = vector.load %arg2[%c0, %c0_0] : memref<64x384xbf16, #tpu.memory_space<vmem>>, vector<64x384xbf16>
    %c0_1 = arith.constant 0 : index
    %c0_2 = arith.constant 0 : index
    %1 = vector.load %arg3[%c0_1, %c0_2] : memref<384x256xbf16, #tpu.memory_space<vmem>>, vector<384x256xbf16>
    %cst = arith.constant dense<0.000000e+00> : vector<64x256xf32>
    %2 = tpu.matmul %0, %1, %cst {dimension_numbers = #tpu.dot_dimension_numbers<[1], [0], [0], [1], [0, 0, 1, 1], [], []>} : vector<64x384xbf16>, vector<384x256xbf16>, vector<64x256xf32> -> vector<64x256xf32>
    %c0_3 = arith.constant 0 : index
    %c0_4 = arith.constant 0 : index
    %3 = vector.load %arg4[%c0_3, %c0_4] : memref<1x256xf32, #tpu.memory_space<vmem>>, vector<1x256xf32>
    %4 = vector.broadcast %3 : vector<1x256xf32> to vector<64x256xf32>
    %5 = arith.addf %2, %4 : vector<64x256xf32>
    %c0_5 = arith.constant 0 : index
    %c0_6 = arith.constant 0 : index
    %6 = vector.load %arg5[%c0_5, %c0_6] : memref<64x256xf32, #tpu.memory_space<vmem>>, vector<64x256xf32>
    tpu.vector_store %arg5[%c0_5, %c0_6], %5 {strides = array<i32>} : memref<64x256xf32, #tpu.memory_space<vmem>>, vector<64x256xf32>,
    return
  }
  func.func @transform_0(%arg0: i32, %arg1: i32) -> (i32, i32) {
    %c0_i32 = arith.constant 0 : i32
    %c0_i32_0 = arith.constant 0 : i32
    return %arg0, %c0_i32 : i32, i32
  }
  func.func @transform_1(%arg0: i32, %arg1: i32) -> (i32, i32) {
    %c0_i32 = arith.constant 0 : i32
    %c0_i32_0 = arith.constant 0 : i32
    return %c0_i32, %arg1 : i32, i32
  }
  func.func @transform_2(%arg0: i32, %arg1: i32) -> (i32, i32) {
    %c0_i32 = arith.constant 0 : i32
    %c0_i32_0 = arith.constant 0 : i32
    return %c0_i32, %arg1 : i32, i32
  }
  func.func @transform_3(%arg0: i32, %arg1: i32) -> (i32, i32) {
    %c0_i32 = arith.constant 0 : i32
    return %arg0, %arg1 : i32, i32
  }
}

</mosaic_0001>

<bundles_post_ra>
// kernel: tpu_custom_call.1
= control target key start
LH: loop header
LB: loop body
LE: loop exit
PB: predicated region body
PF: predicated region fallthrough
CT: control target
= control target key end

     0   :  { %8 = vsyncpa [#allocation3], 0  ;;  %s959_s0 = inlined_call_operand.hbm [shape: bf16[64,384], index: 0, kind: input, shape index: {}]   ;;  %s960_s1 = inlined_call_operand.hbm [shape: bf16[384,256], index: 1, kind: input, shape index: {}]   ;;  %s961_s2 = inlined_call_operand.vmem [shape: f32[1,256], index: 2, kind: input, shape index: {}]   ;;  %s962_s3 = inlined_call_operand.hbm [shape: f32[64,256], index: 3, kind: output, shape index: {}]  }
   0x1   :  { %9 = vsyncpa [#allocation6], 0 }
   0x2   :  { %10 = vsyncpa [#allocation4], 0  ;;  %s866_s12 = smov [#allocation2]   ;;  %s794_s16 = scalar_lea.hbm %s959_s0, 1536 }
   0x3   :  { %s16_s13 = sshll.u32 %s866_s12, 4  ;;  %p795_p0 = scmp.ne.s32.totalorder %s959_s0, %s794_s16  ;;  %s17_s13 = int_to_ptr.vmem [resolvable:$true] %s16_s13 }
   0x4   :  { %p798_p1 = scmp.lt.u32.totalorder %s794_s16, %s959_s0 }
   0x6   :  { %p800_p2 = pnand %p798_p1, %p795_p0 }
   0x8   :  { %803 = shalt.err (!%p800_p2)
}
   0x9   :  { %s804_s21 = scalar_lea.vmem %s17_s13, 1536  ;;  %p809_p4 = scmp.lt.s32.totalorder %s17_s13, %s17_s13 }
   0xa   :  { %p805_p3 = scmp.ne.s32.totalorder %s17_s13, %s804_s21  ;;  %p810_p5 = scmp.lt.s32.totalorder %s804_s21, %s804_s21 }
   0xc   :  { %p811_p6 = por %p810_p5, %p809_p4 }
   0xe   :  { %p812_p7 = pnand %p811_p6, %p805_p3 }
  0x10   :  { %815 = shalt.err (!%p812_p7)
}
  0x11   :  { %s867_s22 = smov 192   ;;  %s868_s23 = smov 12  }
  0x12   :  { %22 = dma.hbm_to_vmem [thread:$0]  %s959_s0, 1536, %s17_s13, [#allocation3], %s867_s22, %s867_s22, %s868_s23  }
  0x13   :  { %s869_s26 = smov [#allocation5]   ;;  %s816_s30 = scalar_lea.hbm %s960_s1, 6144 }
  0x14   :  { %s28_s27 = sshll.u32 %s869_s26, 4  ;;  %p817_p8 = scmp.ne.s32.totalorder %s960_s1, %s816_s30  ;;  %s29_s27 = int_to_ptr.vmem [resolvable:$true] %s28_s27 }
  0x15   :  { %p820_p9 = scmp.lt.u32.totalorder %s816_s30, %s960_s1 }
  0x17   :  { %p822_p10 = pnand %p820_p9, %p817_p8 }
  0x19   :  { %825 = shalt.err (!%p822_p10)
}
  0x1a   :  { %s826_s8 = scalar_lea.vmem %s29_s27, 6144  ;;  %p831_p12 = scmp.lt.s32.totalorder %s29_s27, %s29_s27 }
  0x1b   :  { %p827_p11 = scmp.ne.s32.totalorder %s29_s27, %s826_s8  ;;  %p832_p13 = scmp.lt.s32.totalorder %s826_s8, %s826_s8 }
  0x1d   :  { %p833_p0 = por %p832_p13, %p831_p12 }
  0x1f   :  { %p834_p1 = pnand %p833_p0, %p827_p11 }
  0x21   :  { %837 = shalt.err (!%p834_p1)
}
  0x22   :  { %s870_s0 = smov 128   ;;  %s871_s9 = smov 8  }
  0x23   :  { %34 = dma.hbm_to_vmem [thread:$0]  %s960_s1, 6144, %s29_s27, [#allocation6], %s870_s0, %s870_s0, %s871_s9  }
  0x24   :  { %860 = dma.done.wait [#allocation3], 1536  }
  0x25   :  { %861 = vsyncadd [#allocation3], 4294965760 }
  0x26   :  { %862 = dma.done.wait [#allocation6], 6144  }
  0x27   :  { %863 = vsyncadd [#allocation6], 4294961152  ;;  %v872_v0 = vmov 0   ;;  %v706_v1 = vld [vmem:[#allocation5 + $0x4] ss:$8 sps:$4 sm:$0xff]  }
  0x28   :  { %529 = vmatprep.mubr.bf16.mxu0 %v872_v0  ;;  %v708_v2 = vld [vmem:[#allocation5] ss:$8 sps:$4 sm:$0xff]   ;;  %424 = vmatprep.subr.bf16.mxu1 %v706_v1  ;;  %v709_v3 = vld [vmem:[#allocation5 + $0x14] ss:$8 sps:$4 sm:$0xff]   ;;  %v711_v4 = vld [vmem:[#allocation5 + $0x10] ss:$8 sps:$4 sm:$0xff]   ;;  %v110_v1 = vlaneseq }
  0x29   :  { %425 = vmatpush1.bf16.msra.mxu1 %v708_v2  ;;  %v712_v5 = vld [vmem:[#allocation5 + $0x24] ss:$8 sps:$4 sm:$0xff]   ;;  %v714_v6 = vld [vmem:[#allocation5 + $0x20] ss:$8 sps:$4 sm:$0xff]   ;;  %v715_v7 = vld [vmem:[#allocation5 + $0x34] ss:$8 sps:$4 sm:$0xff]  }
  0x2a   :  { %426 = vmatprep.subr.bf16.mxu1 %v709_v3  ;;  %v717_v8 = vld [vmem:[#allocation5 + $0x30] ss:$8 sps:$4 sm:$0xff]   ;;  %v730_v9 = vld [vmem:[#allocation5 + $0x104] ss:$8 sps:$4 sm:$0xff]   ;;  %v734_v11 = vld [vmem:[#allocation5 + $0x100] ss:$8 sps:$4 sm:$0xff]  }
  0x2b   :  { %v718_v10 = vld [vmem:[#allocation5 + $0x44] ss:$8 sps:$4 sm:$0xff]   ;;  %497 = vmatprep.subr.bf16.mxu0 %v730_v9  ;;  %v736_v12 = vld [vmem:[#allocation5 + $0x114] ss:$8 sps:$4 sm:$0xff]   ;;  %v720_v13 = vld [vmem:[#allocation5 + $0x40] ss:$8 sps:$4 sm:$0xff]  }
  0x2c   :  { %498 = vmatpush1.bf16.msra.mxu0 %v734_v11  ;;  %v721_v14 = vld [vmem:[#allocation5 + $0x54] ss:$8 sps:$4 sm:$0xff]   ;;  %v740_v15 = vld [vmem:[#allocation5 + $0x110] ss:$8 sps:$4 sm:$0xff]   ;;  %v742_v16 = vld [vmem:[#allocation5 + $0x124] ss:$8 sps:$4 sm:$0xff]  }
  0x2d   :  { %427 = vmatpush1.bf16.msra.mxu1 %v711_v4  ;;  %499 = vmatprep.subr.bf16.mxu0 %v736_v12  ;;  %v723_v17 = vld [vmem:[#allocation5 + $0x50] ss:$8 sps:$4 sm:$0xff]   ;;  %v746_v18 = vld [vmem:[#allocation5 + $0x120] ss:$8 sps:$4 sm:$0xff]   ;;  %v748_v19 = vld [vmem:[#allocation5 + $0x134] ss:$8 sps:$4 sm:$0xff]  }
  0x2e   :  { %428 = vmatprep.subr.bf16.mxu1 %v712_v5  ;;  %v724_v20 = vld [vmem:[#allocation5 + $0x64] ss:$8 sps:$4 sm:$0xff]   ;;  %v752_v21 = vld [vmem:[#allocation5 + $0x130] ss:$8 sps:$4 sm:$0xff]   ;;  %v726_v22 = vld [vmem:[#allocation5 + $0x60] ss:$8 sps:$4 sm:$0xff]  }
  0x2f   :  { %v754_v23 = vld [vmem:[#allocation5 + $0x144] ss:$8 sps:$4 sm:$0xff]   ;;  %v727_v24 = vld [vmem:[#allocation5 + $0x74] ss:$8 sps:$4 sm:$0xff]   ;;  %v729_v25 = vld [vmem:[#allocation5 + $0x70] ss:$8 sps:$4 sm:$0xff]  }
  0x30   :  { %500 = vmatpush1.bf16.msra.mxu0 %v740_v15  ;;  %v758_v26 = vld [vmem:[#allocation5 + $0x140] ss:$8 sps:$4 sm:$0xff]   ;;  %v760_v27 = vld [vmem:[#allocation5 + $0x154] ss:$8 sps:$4 sm:$0xff]   ;;  %v732_v28 = vld [vmem:[#allocation5 + $0x84] ss:$8 sps:$4 sm:$0xff]  }
  0x31   :  { %429 = vmatpush1.bf16.msra.mxu1 %v714_v6  ;;  %501 = vmatprep.subr.bf16.mxu0 %v742_v16  ;;  %v764_v29 = vld [vmem:[#allocation5 + $0x150] ss:$8 sps:$4 sm:$0xff]   ;;  %v735_v30 = vld [vmem:[#allocation5 + $0x80] ss:$8 sps:$4 sm:$0xff]   ;;  %v766_v31 = vld [vmem:[#allocation5 + $0x164] ss:$8 sps:$4 sm:$0xff]  }
  0x32   :  { %430 = vmatprep.subr.bf16.mxu1 %v715_v7  ;;  %v738_v32 = vld [vmem:[#allocation5 + $0x94] ss:$8 sps:$4 sm:$0xff]   ;;  %v741_v33 = vld [vmem:[#allocation5 + $0x90] ss:$8 sps:$4 sm:$0xff]   ;;  %v770_v35 = vld [vmem:[#allocation5 + $0x160] ss:$8 sps:$4 sm:$0xff]  }
  0x33   :  { %v780_v34 = vld [vmem:[#allocation2 + $0x4] ss:$12 sps:$4 sm:$0xff]   ;;  %v772_v36 = vld [vmem:[#allocation5 + $0x174] ss:$8 sps:$4 sm:$0xff]   ;;  %v747_v39 = vld [vmem:[#allocation5 + $0xa0] ss:$8 sps:$4 sm:$0xff]  }
  0x34   :  { %502 = vmatpush1.bf16.msra.mxu0 %v746_v18  ;;  %v744_v37 = vld [vmem:[#allocation5 + $0xa4] ss:$8 sps:$4 sm:$0xff]   ;;  %456 = vmatprep.mubr.bf16.mxu1 %v780_v34  ;;  %v776_v38 = vld [vmem:[#allocation5 + $0x170] ss:$8 sps:$4 sm:$0xff]   ;;  %v750_v40 = vld [vmem:[#allocation5 + $0xb4] ss:$8 sps:$4 sm:$0xff]  }
  0x35   :  { %431 = vmatpush1.bf16.msra.mxu1 %v717_v8  ;;  %503 = vmatprep.subr.bf16.mxu0 %v748_v19  ;;  %v781_v41 = vld [vmem:[#allocation2 + $0x8] ss:$12 sps:$4 sm:$0xff]   ;;  %v753_v42 = vld [vmem:[#allocation5 + $0xb0] ss:$8 sps:$4 sm:$0xff]   ;;  %v756_v43 = vld [vmem:[#allocation5 + $0xc4] ss:$8 sps:$4 sm:$0xff]  }
  0x36   :  { %432 = vmatprep.subr.bf16.mxu1 %v718_v10  ;;  %v759_v44 = vld [vmem:[#allocation5 + $0xc0] ss:$8 sps:$4 sm:$0xff]   ;;  %v762_v45 = vld [vmem:[#allocation5 + $0xd4] ss:$8 sps:$4 sm:$0xff]   ;;  %v765_v47 = vld [vmem:[#allocation5 + $0xd0] ss:$8 sps:$4 sm:$0xff]  }
  0x37   :  { %v784_v46 = vld [vmem:[#allocation2 + $0x20] ss:$12 sps:$4 sm:$0xff]   ;;  %v774_v50 = vld [vmem:[#allocation5 + $0xf4] ss:$8 sps:$4 sm:$0xff]   ;;  %v788_v51 = vld [vmem:[#allocation2 + $0x38] ss:$12 sps:$4 sm:$0xff]  }
  0x38   :  { %504 = vmatpush1.bf16.msra.mxu0 %v752_v21  ;;  %v768_v48 = vld [vmem:[#allocation5 + $0xe4] ss:$8 sps:$4 sm:$0xff]   ;;  %v771_v49 = vld [vmem:[#allocation5 + $0xe0] ss:$8 sps:$4 sm:$0xff]   ;;  %v777_v52 = vld [vmem:[#allocation5 + $0xf0] ss:$8 sps:$4 sm:$0xff]  }
  0x39   :  { %433 = vmatpush1.bf16.msra.mxu1 %v720_v13  ;;  %505 = vmatprep.subr.bf16.mxu0 %v754_v23  ;;  %v778_v53 = vld [vmem:[#allocation2] ss:$12 sps:$4 sm:$0xff]   ;;  %v782_v54 = vld [vmem:[#allocation2 + $0x1c] ss:$12 sps:$4 sm:$0xff]   ;;  %v785_v56 = vld [vmem:[#allocation2 + $0x18] ss:$12 sps:$4 sm:$0xff]  }
  0x3a   :  { %434 = vmatprep.subr.bf16.mxu1 %v721_v14  ;;  %v792_v55 = vld [vmem:[#allocation2 + $0x50] ss:$12 sps:$4 sm:$0xff]   ;;  %v786_v57 = vld [vmem:[#allocation2 + $0x34] ss:$12 sps:$4 sm:$0xff]   ;;  %v790_v59 = vld [vmem:[#allocation2 + $0x4c] ss:$12 sps:$4 sm:$0xff]  }
  0x3b   :  { %v789_v58 = vld [vmem:[#allocation2 + $0x30] ss:$12 sps:$4 sm:$0xff]   ;;  %v793_v60 = vld [vmem:[#allocation2 + $0x48] ss:$12 sps:$4 sm:$0xff]   ;;  %v111_v4 = vshrl.u32 %v110_v1, 7 }
  0x3c   :  { %506 = vmatpush1.bf16.msra.mxu0 %v758_v26  ;;  %v108_v8 = vld [vmem:[%s961_s2] sm:$0x3]  ;;  %s873_s2 = smov [#allocation7]  }
  0x3d   :  { %435 = vmatpush1.bf16.msra.mxu1 %v723_v17  ;;  %507 = vmatprep.subr.bf16.mxu0 %v760_v27  ;;  %v112_v7 = vsub.s32 0, %v111_v4  ;;  %v116_v9 = vsub.s32 1, %v111_v4  ;;  %s591_s13 = sshll.u32 %s873_s2, 4  ;;  %s592_s13 = int_to_ptr.vmem [resolvable:$true] %s591_s13 }
  0x3e   :  { %436 = vmatprep.subr.bf16.mxu1 %v724_v20  ;;  %s838_s14 = scalar_lea.vmem %s592_s13, 2048  ;;  %p843_p3 = scmp.lt.s32.totalorder %s592_s13, %s592_s13 }
  0x3f   :  { %v927_v12 = vrot.slane %v108_v8, %v112_v7  ;;  %v929_v14 = vrot.slane %v108_v8, %v116_v9  ;;  %p839_p2 = scmp.ne.s32.totalorder %s592_s13, %s838_s14  ;;  %p844_p4 = scmp.lt.s32.totalorder %s838_s14, %s838_s14 }
  0x40   :  { %508 = vmatpush1.bf16.msra.mxu0 %v764_v29 }
  0x41   :  { %437 = vmatpush1.bf16.msra.mxu1 %v726_v22  ;;  %509 = vmatprep.subr.bf16.mxu0 %v766_v31  ;;  %p845_p5 = por %p844_p4, %p843_p3 }
  0x42   :  { %438 = vmatprep.subr.bf16.mxu1 %v727_v24 }
  0x43   :  { %p846_p6 = pnand %p845_p5, %p839_p2 }
  0x44   :  { %510 = vmatpush1.bf16.msra.mxu0 %v770_v35 }
  0x45   :  { %439 = vmatpush1.bf16.msra.mxu1 %v729_v25  ;;  %511 = vmatprep.subr.bf16.mxu0 %v772_v36 }
  0x46   :  { %440 = vmatprep.subr.bf16.mxu1 %v732_v28 }
  0x48   :  { %512 = vmatpush1.bf16.msra.mxu0 %v776_v38 }
  0x49   :  { %441 = vmatpush1.bf16.msra.mxu1 %v735_v30 }
  0x4a   :  { %442 = vmatprep.subr.bf16.mxu1 %v738_v32 }
  0x4b   :  { %530 = vmatmul.mubr.bf16.vlgmr.msra.gmra.mrb[0].mxu0 %v781_v41 }
  0x4c   :  { %539 = vmatprep.mubr.bf16.mxu0 %v872_v0 }
  0x4d   :  { %443 = vmatpush1.bf16.msra.mxu1 %v741_v33 }
  0x4e   :  { %444 = vmatprep.subr.bf16.mxu1 %v744_v37 }
  0x51   :  { %445 = vmatpush1.bf16.msra.mxu1 %v747_v39 }
  0x52   :  { %446 = vmatprep.subr.bf16.mxu1 %v750_v40 }
  0x53   :  { %540 = vmatmul.mubr.bf16.gmra.mrb[4].mxu0 %v784_v46 }
  0x54   :  { %549 = vmatprep.mubr.bf16.mxu0 %v872_v0 }
  0x55   :  { %447 = vmatpush1.bf16.msra.mxu1 %v753_v42 }
  0x56   :  { %448 = vmatprep.subr.bf16.mxu1 %v756_v43 }
  0x59   :  { %449 = vmatpush1.bf16.msra.mxu1 %v759_v44 }
  0x5a   :  { %450 = vmatprep.subr.bf16.mxu1 %v762_v45 }
  0x5b   :  { %550 = vmatmul.mubr.bf16.gmra.mrb[8].mxu0 %v788_v51 }
  0x5c   :  { %559 = vmatprep.mubr.bf16.mxu0 %v872_v0 }
  0x5d   :  { %451 = vmatpush1.bf16.msra.mxu1 %v765_v47 }
  0x5e   :  { %452 = vmatprep.subr.bf16.mxu1 %v768_v48 }
  0x61   :  { %453 = vmatpush1.bf16.msra.mxu1 %v771_v49 }
  0x62   :  { %454 = vmatprep.subr.bf16.mxu1 %v774_v50 }
  0x63   :  { %560 = vmatmul.mubr.bf16.gmra.mrb[12].mxu0 %v792_v55 }
  0x65   :  { %455 = vmatpush1.bf16.msra.mxu1 %v777_v52 }
  0x68   :  { %457 = vmatmul.mubr.bf16.vlgmr.msra.gmra.mrb[0].mxu1 %v778_v53 }
  0x69   :  { %466 = vmatprep.mubr.bf16.mxu1 %v782_v54 }
  0x70   :  { %467 = vmatmul.mubr.bf16.gmra.mrb[4].mxu1 %v785_v56 }
  0x71   :  { %476 = vmatprep.mubr.bf16.mxu1 %v786_v57 }
  0x78   :  { %477 = vmatmul.mubr.bf16.gmra.mrb[8].mxu1 %v789_v58 }
  0x79   :  { %486 = vmatprep.mubr.bf16.mxu1 %v790_v59 }
  0x80   :  { %487 = vmatmul.mubr.bf16.gmra.mrb[12].mxu1 %v793_v60 }
 0x11e   :  { %v531_v61 = vpop.f32.mrb[0].mxu0 }
 0x11f   :  { %v533_v62 = vpop.f32.mrb[1].mxu0 }
 0x120   :  { %v535_v63 = vpop.f32.mrb[2].mxu0 }
 0x121   :  { %v537_v0 = vpop.f32.mrb[3].mxu0 }
 0x126   :  { %v541_v2 = vpop.f32.mrb[4].mxu0 }
 0x127   :  { %v543_v3 = vpop.f32.mrb[5].mxu0 }
 0x128   :  { %v545_v5 = vpop.f32.mrb[6].mxu0 }
 0x129   :  { %v547_v6 = vpop.f32.mrb[7].mxu0 }
 0x12e   :  { %v551_v10 = vpop.f32.mrb[8].mxu0 }
 0x12f   :  { %v553_v11 = vpop.f32.mrb[9].mxu0 }
 0x130   :  { %v555_v13 = vpop.f32.mrb[10].mxu0 }
 0x131   :  { %v557_v15 = vpop.f32.mrb[11].mxu0 }
 0x136   :  { %v561_v24 = vpop.f32.mrb[12].mxu0 }
 0x137   :  { %v563_v27 = vpop.f32.mrb[13].mxu0 }
 0x138   :  { %v565_v29 = vpop.f32.mrb[14].mxu0 }
 0x139   :  { %v567_v31 = vpop.f32.mrb[15].mxu0 }
 0x13b   :  { %v458_v16 = vpop.f32.mrb[0].mxu1 }
 0x13c   :  { %v459_v17 = vadd.f32 %v458_v16, %v927_v12  ;;  %v460_v18 = vpop.f32.mrb[1].mxu1 }
 0x13d   :  { %v461_v19 = vadd.f32 %v460_v18, %v929_v14  ;;  %v462_v20 = vpop.f32.mrb[2].mxu1 }
 0x13e   :  { %v532_v21 = vadd.f32 %v531_v61, %v459_v17  ;;  %v463_v22 = vadd.f32 %v462_v20, %v927_v12  ;;  %v464_v23 = vpop.f32.mrb[3].mxu1 }
 0x13f   :  { %v534_v25 = vadd.f32 %v533_v62, %v461_v19  ;;  %v465_v26 = vadd.f32 %v464_v23, %v929_v14 }
 0x140   :  { %570 = vst [vmem:[#allocation7] sm:$0xff] %v532_v21  ;;  %v536_v28 = vadd.f32 %v535_v63, %v463_v22 }
 0x141   :  { %571 = vst [vmem:[#allocation7 + $0x8] sm:$0xff] %v534_v25  ;;  %v538_v30 = vadd.f32 %v537_v0, %v465_v26 }
 0x142   :  { %572 = vst [vmem:[#allocation7 + $0x10] sm:$0xff] %v536_v28 }
 0x143   :  { %573 = vst [vmem:[#allocation7 + $0x18] sm:$0xff] %v538_v30  ;;  %v468_v32 = vpop.f32.mrb[4].mxu1 }
 0x144   :  { %v469_v33 = vadd.f32 %v468_v32, %v927_v12  ;;  %v470_v34 = vpop.f32.mrb[5].mxu1 }
 0x145   :  { %v471_v35 = vadd.f32 %v470_v34, %v929_v14  ;;  %v472_v36 = vpop.f32.mrb[6].mxu1 }
 0x146   :  { %v542_v37 = vadd.f32 %v541_v2, %v469_v33  ;;  %v473_v38 = vadd.f32 %v472_v36, %v927_v12  ;;  %v474_v39 = vpop.f32.mrb[7].mxu1 }
 0x147   :  { %v544_v40 = vadd.f32 %v543_v3, %v471_v35  ;;  %v475_v41 = vadd.f32 %v474_v39, %v929_v14 }
 0x148   :  { %574 = vst [vmem:[#allocation7 + $0x20] sm:$0xff] %v542_v37  ;;  %v546_v42 = vadd.f32 %v545_v5, %v473_v38 }
 0x149   :  { %575 = vst [vmem:[#allocation7 + $0x28] sm:$0xff] %v544_v40  ;;  %v548_v43 = vadd.f32 %v547_v6, %v475_v41 }
 0x14a   :  { %576 = vst [vmem:[#allocation7 + $0x30] sm:$0xff] %v546_v42 }
 0x14b   :  { %577 = vst [vmem:[#allocation7 + $0x38] sm:$0xff] %v548_v43  ;;  %v478_v44 = vpop.f32.mrb[8].mxu1 }
 0x14c   :  { %v479_v45 = vadd.f32 %v478_v44, %v927_v12  ;;  %v480_v46 = vpop.f32.mrb[9].mxu1 }
 0x14d   :  { %v481_v47 = vadd.f32 %v480_v46, %v929_v14  ;;  %v482_v48 = vpop.f32.mrb[10].mxu1 }
 0x14e   :  { %v552_v49 = vadd.f32 %v551_v10, %v479_v45  ;;  %v483_v50 = vadd.f32 %v482_v48, %v927_v12  ;;  %v484_v51 = vpop.f32.mrb[11].mxu1 }
 0x14f   :  { %v554_v52 = vadd.f32 %v553_v11, %v481_v47  ;;  %v485_v53 = vadd.f32 %v484_v51, %v929_v14 }
 0x150   :  { %578 = vst [vmem:[#allocation7 + $0x40] sm:$0xff] %v552_v49  ;;  %v556_v54 = vadd.f32 %v555_v13, %v483_v50 }
 0x151   :  { %579 = vst [vmem:[#allocation7 + $0x48] sm:$0xff] %v554_v52  ;;  %v558_v55 = vadd.f32 %v557_v15, %v485_v53 }
 0x152   :  { %580 = vst [vmem:[#allocation7 + $0x50] sm:$0xff] %v556_v54 }
 0x153   :  { %581 = vst [vmem:[#allocation7 + $0x58] sm:$0xff] %v558_v55  ;;  %v488_v56 = vpop.f32.mrb[12].mxu1 }
 0x154   :  { %v489_v57 = vadd.f32 %v488_v56, %v927_v12  ;;  %v490_v58 = vpop.f32.mrb[13].mxu1 }
 0x155   :  { %v491_v59 = vadd.f32 %v490_v58, %v929_v14  ;;  %v492_v60 = vpop.f32.mrb[14].mxu1 }
 0x156   :  { %v562_v61 = vadd.f32 %v561_v24, %v489_v57  ;;  %v493_v62 = vadd.f32 %v492_v60, %v927_v12  ;;  %v494_v63 = vpop.f32.mrb[15].mxu1 }
 0x157   :  { %v564_v0 = vadd.f32 %v563_v27, %v491_v59  ;;  %v495_v1 = vadd.f32 %v494_v63, %v929_v14 }
 0x158   :  { %582 = vst [vmem:[#allocation7 + $0x60] sm:$0xff] %v562_v61  ;;  %v566_v2 = vadd.f32 %v565_v29, %v493_v62 }
 0x159   :  { %583 = vst [vmem:[#allocation7 + $0x68] sm:$0xff] %v564_v0  ;;  %v568_v3 = vadd.f32 %v567_v31, %v495_v1 }
 0x15a   :  { %584 = vst [vmem:[#allocation7 + $0x70] sm:$0xff] %v566_v2 }
 0x15b   :  { %585 = vst [vmem:[#allocation7 + $0x78] sm:$0xff] %v568_v3 }
 0x15c   :  { %849 = shalt.err (!%p846_p6)
}
 0x15d   :  { %s850_s17 = scalar_lea.hbm %s962_s3, 2048 }
 0x15e   :  { %p851_p7 = scmp.ne.s32.totalorder %s962_s3, %s850_s17  ;;  %p854_p8 = scmp.lt.u32.totalorder %s850_s17, %s962_s3 }
 0x160   :  { %p856_p9 = pnand %p854_p8, %p851_p7 }
 0x162   :  { %859 = shalt.err (!%p856_p9)
}
 0x163   :  { %s874_s22 = smov 256   ;;  %s875_s23 = smov 16  }
 0x164   :  { %597 = dma.vmem_to_hbm [thread:$0]  %s592_s13, 2048, %s962_s3, [#allocation4], %s874_s22, %s874_s22, %s875_s23  }
 0x165   :  { %864 = dma.done.wait [#allocation4], 2048  }
 0x166   :  { %865 = vsyncadd [#allocation4], 4294965248 }
 0x167   :  { %601 = vsyncpa [#allocation3], 1 }
 0x168   :  { %602 = vsyncpa [#allocation6], 1 }
 0x169   :  { %603 = vsyncpa [#allocation4], 1 }

</bundles_post_ra>
